<compile_context>
chip_gen: v6e
topology: v6e:2x2x1
jax: 0.10.0
libtpu: 0.0.40
codegen_flags: <defaults>
</compile_context>

<pallas_src>
import jax
import jax.numpy as jnp
from jax.experimental import pallas as pl
from jax.experimental.pallas import tpu as pltpu

_MIB = 1024 * 1024


def _round_up(x, m):
    return (x + m - 1) // m * m


def _vmem_capacity_bytes():
    """Best-effort physical-VMEM query; conservative (v7x) fallback."""
    try:
        info = pltpu.get_tpu_info()
        cap = getattr(info, "vmem_capacity_bytes", None)
        if cap:
            return int(cap)
    except Exception:
        pass
    return 64 * _MIB


def _projector_kernel(x_ref, w1_ref, b1_ref, w2_ref, b2_ref, o_ref, h_ref):
    # Grid = (row tiles i, output-column tiles j of linear2).
    # The ReLU'd hidden activation for this row tile is computed once
    # (j == 0) and cached in VMEM scratch; every j step only runs the second
    # matmul on an (hid_p, tn) column slab of W2.
    @pl.when(pl.program_id(1) == 0)
    def _():
        # In-kernel cast of the activation tile to the matmul dtype (free on
        # the VPU under the MXU) -- avoids a wrapper-side HBM cast pass.
        x = x_ref[...].astype(w1_ref.dtype)
        h = jnp.dot(x, w1_ref[...], preferred_element_type=jnp.float32)
        h = jnp.maximum(h + b1_ref[...], 0.0)          # bias + ReLU in f32
        h_ref[...] = h.astype(h_ref.dtype)

    o = jnp.dot(h_ref[...], w2_ref[...], preferred_element_type=jnp.float32)
    o_ref[...] = (o + b2_ref[...]).astype(o_ref.dtype)


def prepare_projector_params(w1, b1, w2, b2, *, compute_dtype=jnp.bfloat16,
                             tile_n=None):
    """One-time (load-time) weight prep.

    w1: [out_dim, in_dim], b1: [out_dim], w2: [out_dim, out_dim],
    b2: [out_dim]   (PyTorch nn.Linear layout).

    Transposes to x @ W layout, pads feature dims (lane-dense), casts matmul
    operands to `compute_dtype`.  Biases stay f32 for the epilogue.

    `tile_n` (linear2 output-column tile) is chosen HERE, and linear2's output
    dim is padded up to a multiple of it.  tile_n=None picks per generation:
    full out_dim on 128 MiB-VMEM chips (v5e/v6e -> W2 fully resident, DMA'd
    once), 1024 on 64 MiB chips (v7x -> column-streamed).
    """
    out_dim, in_dim = w1.shape
    in_p = _round_up(in_dim, 128)
    hid_p = _round_up(out_dim, 128)          # hidden dim (cols of W1 / rows of W2)

    if tile_n is None:
        tile_n = hid_p if _vmem_capacity_bytes() >= 100 * _MIB else 1024
    tn = max((min(tile_n, hid_p) // 128) * 128, 128)
    out_p = _round_up(hid_p, tn)             # linear2 output cols, multiple of tn

    w1_t = jnp.zeros((in_p, hid_p), compute_dtype).at[:in_dim, :out_dim].set(
        jnp.transpose(w1).astype(compute_dtype))
    w2_t = jnp.zeros((hid_p, out_p), compute_dtype).at[:out_dim, :out_dim].set(
        jnp.transpose(w2).astype(compute_dtype))
    b1_row = jnp.zeros((1, hid_p), jnp.float32).at[0, :out_dim].set(
        b1.astype(jnp.float32))
    b2_row = jnp.zeros((1, out_p), jnp.float32).at[0, :out_dim].set(
        b2.astype(jnp.float32))

    return dict(w1_t=w1_t, b1=b1_row, w2_t=w2_t, b2=b2_row,
                in_dim=in_dim, out_dim=out_dim,
                compute_dtype=compute_dtype, tn=tn)


def multimodal_projector(audio_features, params, *, tile_m=512, out_dtype=None,
                         vmem_limit_bytes=None, use_buffer_hints=True):
    """audio_features: [B, S, in_dim] -> [B, S, out_dim]."""
    B, S, in_dim = audio_features.shape
    assert in_dim == params["in_dim"], "in_dim mismatch with prepared params"
    out_dim = params["out_dim"]
    cdt = params["compute_dtype"]
    tn = params["tn"]
    w1_t, b1 = params["w1_t"], params["b1"]
    w2_t, b2 = params["w2_t"], params["b2"]
    in_p, hid_p = w1_t.shape
    out_p = w2_t.shape[1]

    if out_dtype is None:
        # Matches the module semantics (dtype-in == dtype-out).  Pass bf16 if
        # the downstream consumer accepts it: halves output VMEM + writeback.
        out_dtype = audio_features.dtype

    # --- flatten rows (a view, no copy); pad ONLY when strictly required so
    #     the common aligned case adds no extra HBM pass over activations.
    M = B * S
    x2d = audio_features.reshape(M, in_dim)
    M8 = _round_up(M, 8)
    pad_rows, pad_cols = M8 - M, in_p - in_dim
    if pad_rows or pad_cols:
        x2d = jnp.pad(x2d, ((0, pad_rows), (0, pad_cols)))

    # --- row tiling: large tiles make the steady-state j steps MXU-bound and
    #     amortize per-grid-step overhead; tiny inputs get a single tile.
    tm = max(8, min(_round_up(tile_m, 8), M8))
    grid_i = pl.cdiv(M8, tm)
    grid_j = out_p // tn
    grid = (grid_i, grid_j)

    # --- megacore gating: don't duplicate the weight stream across cores when
    #     there is only one row tile of compute to split.
    row_sem = "parallel" if grid_i > 1 else "arbitrary"
    dims = (row_sem, "arbitrary")

    # --- VMEM budget: capacity minus headroom (never the full 64 MiB on v7x).
    if vmem_limit_bytes is None:
        vmem_limit_bytes = min(_vmem_capacity_bytes() - 12 * _MIB, 100 * _MIB)

    # --- honest cost estimate (W2 restreamed once per row tile iff N-tiled).
    flops = 2 * M8 * (in_p * hid_p + hid_p * out_p)
    w2_passes = 1 if grid_j == 1 else grid_i
    bytes_accessed = (x2d.size * x2d.dtype.itemsize
                      + w1_t.size * w1_t.dtype.itemsize
                      + w2_passes * w2_t.size * w2_t.dtype.itemsize
                      + b1.size * 4 + grid_i * b2.size * 4
                      + M8 * out_p * jnp.dtype(out_dtype).itemsize)

    def make_specs(with_hints):
        w1_kw = {}
        b1_kw = {}
        w2_kw = {}
        if with_hints:
            # Constant-index specs are DMA'd once; no point double-buffering.
            w1_kw = dict(pipeline_mode=pl.Buffered(1))
            b1_kw = dict(pipeline_mode=pl.Buffered(1))
            if grid_j > 1:
                # Streamed W2 column tiles: extra depth hides the DMA behind
                # the long j == 0 step (x @ W1).  Paid for by W1's freed buffer.
                w2_kw = dict(pipeline_mode=pl.Buffered(3))
        in_specs = [
            pl.BlockSpec((tm, in_p), lambda i, j: (i, 0)),              # x row tile
            pl.BlockSpec((in_p, hid_p), lambda i, j: (0, 0), **w1_kw),  # W1^T (full)
            pl.BlockSpec((1, hid_p), lambda i, j: (0, 0), **b1_kw),     # b1
            pl.BlockSpec((hid_p, tn), lambda i, j: (0, j), **w2_kw),    # W2^T col tile
            pl.BlockSpec((1, tn), lambda i, j: (0, j)),                 # b2 col tile
        ]
        out_specs = pl.BlockSpec((tm, tn), lambda i, j: (i, j))
        return in_specs, out_specs

    def build_and_call(with_hints):
        in_specs, out_specs = make_specs(with_hints)
        return pl.pallas_call(
            _projector_kernel,
            out_shape=jax.ShapeDtypeStruct((M8, out_p), out_dtype),
            grid_spec=pltpu.PrefetchScalarGridSpec(
                num_scalar_prefetch=0,
                grid=grid,
                in_specs=in_specs,
                out_specs=out_specs,
                scratch_shapes=[pltpu.VMEM((tm, hid_p), cdt)],  # cached hidden
            ),
            compiler_params=pltpu.CompilerParams(
                dimension_semantics=dims,
                vmem_limit_bytes=vmem_limit_bytes),
            cost_estimate=pl.CostEstimate(flops=flops, transcendentals=0,
                                          bytes_accessed=bytes_accessed),
        )(x2d, w1_t, b1, w2_t, b2)

    if use_buffer_hints:
        try:
            out = build_and_call(True)
        except Exception:
            # Buffered(k) hints failed to lower on this jax/Mosaic version;
            # fall back to default double-buffering (correctness identical).
            out = build_and_call(False)
    else:
        out = build_and_call(False)

    return out[:M, :out_dim].reshape(B, S, out_dim)


if __name__ == "__main__":
    # Small, deterministic synthetic setup (feature dims 128-aligned, as real
    # MiniCPM-o projector dims are, so every block is lane-dense).
    B, S = 2, 8
    in_dim, out_dim = 128, 128

    key = jax.random.PRNGKey(0)
    kx, kw1, kb1, kw2, kb2 = jax.random.split(key, 5)

    audio_features = jax.random.normal(kx, (B, S, in_dim), dtype=jnp.float32)

    # nn.Linear-style deterministic init.
    lim1 = 1.0 / jnp.sqrt(in_dim)
    lim2 = 1.0 / jnp.sqrt(out_dim)
    w1 = jax.random.uniform(kw1, (out_dim, in_dim), jnp.float32, -lim1, lim1)
    b1 = jax.random.uniform(kb1, (out_dim,), jnp.float32, -lim1, lim1)
    w2 = jax.random.uniform(kw2, (out_dim, out_dim), jnp.float32, -lim2, lim2)
    b2 = jax.random.uniform(kb2, (out_dim,), jnp.float32, -lim2, lim2)

    # Pure-JAX reference (same semantics as the PyTorch forward), f32.
    h_ref = jnp.maximum(audio_features @ w1.T + b1, 0.0)
    ref = h_ref @ w2.T + b2

    # f32 compute path: tight check.
    params_f32 = prepare_projector_params(w1, b1, w2, b2,
                                          compute_dtype=jnp.float32)
    out_f32 = jax.block_until_ready(
        multimodal_projector(audio_features, params_f32))
    assert out_f32.shape == (B, S, out_dim)
    assert jnp.allclose(out_f32, ref, atol=1e-4, rtol=1e-4)

    # bf16 compute path (default, f32 accumulation): looser tolerance.
    params_bf16 = prepare_projector_params(w1, b1, w2, b2,
                                           compute_dtype=jnp.bfloat16)
    out_bf16 = jax.block_until_ready(
        multimodal_projector(audio_features, params_bf16))
    assert out_bf16.shape == (B, S, out_dim)
    assert jnp.allclose(out_bf16, ref, atol=5e-2, rtol=5e-2)

    print("KERNEL_OK")
</pallas_src>

<mosaic_0001>
module attributes {stable_mosaic.version = 11 : i64} {
  func.func @_projector_kernel(%arg0: i32, %arg1: i32, %arg2: memref<16x128xf32, #tpu.memory_space<vmem>>, %arg3: memref<128x128xf32, #tpu.memory_space<vmem>>, %arg4: memref<1x128xf32, #tpu.memory_space<vmem>>, %arg5: memref<128x128xf32, #tpu.memory_space<vmem>>, %arg6: memref<1x128xf32, #tpu.memory_space<vmem>>, %arg7: memref<16x128xf32, #tpu.memory_space<vmem>>, %arg8: memref<16x128xf32, #tpu.memory_space<vmem>>) attributes {dimension_semantics = [#tpu.dimension_semantics<arbitrary>, #tpu.dimension_semantics<arbitrary>], iteration_bounds = array<i64: 1, 1>, scalar_prefetch = 0 : i64, scratch_operands = 1 : i64, tpu.core_type = #tpu.core_type<tc>, window_params = [{transform_indices = @transform_0, window_bounds = array<i64: 16, 128>}, {pipeline_mode = #tpu.pipeline_mode<synchronous>, transform_indices = @transform_1, window_bounds = array<i64: 128, 128>}, {pipeline_mode = #tpu.pipeline_mode<synchronous>, transform_indices = @transform_2, window_bounds = array<i64: 1, 128>}, {transform_indices = @transform_3, window_bounds = array<i64: 128, 128>}, {transform_indices = @transform_4, window_bounds = array<i64: 1, 128>}, {transform_indices = @transform_5, window_bounds = array<i64: 16, 128>}]} {
    %c0_i32 = arith.constant 0 : i32
    %0 = arith.cmpi eq, %arg1, %c0_i32 : i32
    %1 = arith.extui %0 : i1 to i32
    %c0_i32_0 = arith.constant 0 : i32
    %2 = arith.cmpi ne, %1, %c0_i32_0 : i32
    scf.if %2 {
      %c0_8 = arith.constant 0 : index
      %c0_9 = arith.constant 0 : index
      %10 = vector.load %arg2[%c0_8, %c0_9] : memref<16x128xf32, #tpu.memory_space<vmem>>, vector<16x128xf32>
      %c0_10 = arith.constant 0 : index
      %c0_11 = arith.constant 0 : index
      %11 = vector.load %arg3[%c0_10, %c0_11] : memref<128x128xf32, #tpu.memory_space<vmem>>, vector<128x128xf32>
      %cst_12 = arith.constant dense<0.000000e+00> : vector<16x128xf32>
      %12 = tpu.matmul %10, %11, %cst_12 {dimension_numbers = #tpu.dot_dimension_numbers<[1], [0], [0], [1], [0, 0, 1, 1], [], []>} : vector<16x128xf32>, vector<128x128xf32>, vector<16x128xf32> -> vector<16x128xf32>
      %c0_13 = arith.constant 0 : index
      %c0_14 = arith.constant 0 : index
      %13 = vector.load %arg4[%c0_13, %c0_14] : memref<1x128xf32, #tpu.memory_space<vmem>>, vector<1x128xf32>
      %14 = vector.broadcast %13 : vector<1x128xf32> to vector<16x128xf32>
      %15 = arith.addf %12, %14 : vector<16x128xf32>
      %cst_15 = arith.constant 0.000000e+00 : f32
      %16 = vector.broadcast %cst_15 : f32 to vector<16x128xf32>
      %17 = arith.maximumf %15, %16 : vector<16x128xf32>
      %c0_16 = arith.constant 0 : index
      %c0_17 = arith.constant 0 : index
      %18 = vector.load %arg8[%c0_16, %c0_17] : memref<16x128xf32, #tpu.memory_space<vmem>>, vector<16x128xf32>
      tpu.vector_store %arg8[%c0_16, %c0_17], %17 {strides = array<i32>} : memref<16x128xf32, #tpu.memory_space<vmem>>, vector<16x128xf32>,
    } else {
    }
    %c0 = arith.constant 0 : index
    %c0_1 = arith.constant 0 : index
    %3 = vector.load %arg8[%c0, %c0_1] : memref<16x128xf32, #tpu.memory_space<vmem>>, vector<16x128xf32>
    %c0_2 = arith.constant 0 : index
    %c0_3 = arith.constant 0 : index
    %4 = vector.load %arg5[%c0_2, %c0_3] : memref<128x128xf32, #tpu.memory_space<vmem>>, vector<128x128xf32>
    %cst = arith.constant dense<0.000000e+00> : vector<16x128xf32>
    %5 = tpu.matmul %3, %4, %cst {dimension_numbers = #tpu.dot_dimension_numbers<[1], [0], [0], [1], [0, 0, 1, 1], [], []>} : vector<16x128xf32>, vector<128x128xf32>, vector<16x128xf32> -> vector<16x128xf32>
    %c0_4 = arith.constant 0 : index
    %c0_5 = arith.constant 0 : index
    %6 = vector.load %arg6[%c0_4, %c0_5] : memref<1x128xf32, #tpu.memory_space<vmem>>, vector<1x128xf32>
    %7 = vector.broadcast %6 : vector<1x128xf32> to vector<16x128xf32>
    %8 = arith.addf %5, %7 : vector<16x128xf32>
    %c0_6 = arith.constant 0 : index
    %c0_7 = arith.constant 0 : index
    %9 = vector.load %arg7[%c0_6, %c0_7] : memref<16x128xf32, #tpu.memory_space<vmem>>, vector<16x128xf32>
    tpu.vector_store %arg7[%c0_6, %c0_7], %8 {strides = array<i32>} : memref<16x128xf32, #tpu.memory_space<vmem>>, vector<16x128xf32>,
    return
  }
  func.func @transform_0(%arg0: i32, %arg1: i32) -> (i32, i32) {
    %c0_i32 = arith.constant 0 : i32
    %c0_i32_0 = arith.constant 0 : i32
    return %arg0, %c0_i32 : i32, i32
  }
  func.func @transform_1(%arg0: i32, %arg1: i32) -> (i32, i32) {
    %c0_i32 = arith.constant 0 : i32
    %c0_i32_0 = arith.constant 0 : i32
    %c0_i32_1 = arith.constant 0 : i32
    return %c0_i32, %c0_i32_0 : i32, i32
  }
  func.func @transform_2(%arg0: i32, %arg1: i32) -> (i32, i32) {
    %c0_i32 = arith.constant 0 : i32
    %c0_i32_0 = arith.constant 0 : i32
    %c0_i32_1 = arith.constant 0 : i32
    return %c0_i32, %c0_i32_0 : i32, i32
  }
  func.func @transform_3(%arg0: i32, %arg1: i32) -> (i32, i32) {
    %c0_i32 = arith.constant 0 : i32
    %c0_i32_0 = arith.constant 0 : i32
    return %c0_i32, %arg1 : i32, i32
  }
  func.func @transform_4(%arg0: i32, %arg1: i32) -> (i32, i32) {
    %c0_i32 = arith.constant 0 : i32
    %c0_i32_0 = arith.constant 0 : i32
    return %c0_i32, %arg1 : i32, i32
  }
  func.func @transform_5(%arg0: i32, %arg1: i32) -> (i32, i32) {
    %c0_i32 = arith.constant 0 : i32
    return %arg0, %arg1 : i32, i32
  }
}

module attributes {stable_mosaic.version = 11 : i64} {
  func.func @_projector_kernel(%arg0: i32, %arg1: i32, %arg2: memref<16x128xf32, #tpu.memory_space<vmem>>, %arg3: memref<128x128xf32, #tpu.memory_space<vmem>>, %arg4: memref<1x128xf32, #tpu.memory_space<vmem>>, %arg5: memref<128x128xf32, #tpu.memory_space<vmem>>, %arg6: memref<1x128xf32, #tpu.memory_space<vmem>>, %arg7: memref<16x128xf32, #tpu.memory_space<vmem>>, %arg8: memref<16x128xf32, #tpu.memory_space<vmem>>) attributes {dimension_semantics = [#tpu.dimension_semantics<arbitrary>, #tpu.dimension_semantics<arbitrary>], iteration_bounds = array<i64: 1, 1>, scalar_prefetch = 0 : i64, scratch_operands = 1 : i64, tpu.core_type = #tpu.core_type<tc>, window_params = [{transform_indices = @transform_0, window_bounds = array<i64: 16, 128>}, {pipeline_mode = #tpu.pipeline_mode<synchronous>, transform_indices = @transform_1, window_bounds = array<i64: 128, 128>}, {pipeline_mode = #tpu.pipeline_mode<synchronous>, transform_indices = @transform_2, window_bounds = array<i64: 1, 128>}, {transform_indices = @transform_3, window_bounds = array<i64: 128, 128>}, {transform_indices = @transform_4, window_bounds = array<i64: 1, 128>}, {transform_indices = @transform_5, window_bounds = array<i64: 16, 128>}]} {
    %c0_i32 = arith.constant 0 : i32
    %0 = arith.cmpi eq, %arg1, %c0_i32 : i32
    %1 = arith.extui %0 : i1 to i32
    %c0_i32_0 = arith.constant 0 : i32
    %2 = arith.cmpi ne, %1, %c0_i32_0 : i32
    scf.if %2 {
      %c0_8 = arith.constant 0 : index
      %c0_9 = arith.constant 0 : index
      %10 = vector.load %arg2[%c0_8, %c0_9] : memref<16x128xf32, #tpu.memory_space<vmem>>, vector<16x128xf32>
      %c0_10 = arith.constant 0 : index
      %c0_11 = arith.constant 0 : index
      %11 = vector.load %arg3[%c0_10, %c0_11] : memref<128x128xf32, #tpu.memory_space<vmem>>, vector<128x128xf32>
      %cst_12 = arith.constant dense<0.000000e+00> : vector<16x128xf32>
      %12 = tpu.matmul %10, %11, %cst_12 {dimension_numbers = #tpu.dot_dimension_numbers<[1], [0], [0], [1], [0, 0, 1, 1], [], []>} : vector<16x128xf32>, vector<128x128xf32>, vector<16x128xf32> -> vector<16x128xf32>
      %c0_13 = arith.constant 0 : index
      %c0_14 = arith.constant 0 : index
      %13 = vector.load %arg4[%c0_13, %c0_14] : memref<1x128xf32, #tpu.memory_space<vmem>>, vector<1x128xf32>
      %14 = vector.broadcast %13 : vector<1x128xf32> to vector<16x128xf32>
      %15 = arith.addf %12, %14 : vector<16x128xf32>
      %cst_15 = arith.constant 0.000000e+00 : f32
      %16 = vector.broadcast %cst_15 : f32 to vector<16x128xf32>
      %17 = arith.maximumf %15, %16 : vector<16x128xf32>
      %c0_16 = arith.constant 0 : index
      %c0_17 = arith.constant 0 : index
      %18 = vector.load %arg8[%c0_16, %c0_17] : memref<16x128xf32, #tpu.memory_space<vmem>>, vector<16x128xf32>
      tpu.vector_store %arg8[%c0_16, %c0_17], %17 {strides = array<i32>} : memref<16x128xf32, #tpu.memory_space<vmem>>, vector<16x128xf32>,
    } else {
    }
    %c0 = arith.constant 0 : index
    %c0_1 = arith.constant 0 : index
    %3 = vector.load %arg8[%c0, %c0_1] : memref<16x128xf32, #tpu.memory_space<vmem>>, vector<16x128xf32>
    %c0_2 = arith.constant 0 : index
    %c0_3 = arith.constant 0 : index
    %4 = vector.load %arg5[%c0_2, %c0_3] : memref<128x128xf32, #tpu.memory_space<vmem>>, vector<128x128xf32>
    %cst = arith.constant dense<0.000000e+00> : vector<16x128xf32>
    %5 = tpu.matmul %3, %4, %cst {dimension_numbers = #tpu.dot_dimension_numbers<[1], [0], [0], [1], [0, 0, 1, 1], [], []>} : vector<16x128xf32>, vector<128x128xf32>, vector<16x128xf32> -> vector<16x128xf32>
    %c0_4 = arith.constant 0 : index
    %c0_5 = arith.constant 0 : index
    %6 = vector.load %arg6[%c0_4, %c0_5] : memref<1x128xf32, #tpu.memory_space<vmem>>, vector<1x128xf32>
    %7 = vector.broadcast %6 : vector<1x128xf32> to vector<16x128xf32>
    %8 = arith.addf %5, %7 : vector<16x128xf32>
    %c0_6 = arith.constant 0 : index
    %c0_7 = arith.constant 0 : index
    %9 = vector.load %arg7[%c0_6, %c0_7] : memref<16x128xf32, #tpu.memory_space<vmem>>, vector<16x128xf32>
    tpu.vector_store %arg7[%c0_6, %c0_7], %8 {strides = array<i32>} : memref<16x128xf32, #tpu.memory_space<vmem>>, vector<16x128xf32>,
    return
  }
  func.func @transform_0(%arg0: i32, %arg1: i32) -> (i32, i32) {
    %c0_i32 = arith.constant 0 : i32
    %c0_i32_0 = arith.constant 0 : i32
    return %arg0, %c0_i32 : i32, i32
  }
  func.func @transform_1(%arg0: i32, %arg1: i32) -> (i32, i32) {
    %c0_i32 = arith.constant 0 : i32
    %c0_i32_0 = arith.constant 0 : i32
    %c0_i32_1 = arith.constant 0 : i32
    return %c0_i32, %c0_i32_0 : i32, i32
  }
  func.func @transform_2(%arg0: i32, %arg1: i32) -> (i32, i32) {
    %c0_i32 = arith.constant 0 : i32
    %c0_i32_0 = arith.constant 0 : i32
    %c0_i32_1 = arith.constant 0 : i32
    return %c0_i32, %c0_i32_0 : i32, i32
  }
  func.func @transform_3(%arg0: i32, %arg1: i32) -> (i32, i32) {
    %c0_i32 = arith.constant 0 : i32
    %c0_i32_0 = arith.constant 0 : i32
    return %c0_i32, %arg1 : i32, i32
  }
  func.func @transform_4(%arg0: i32, %arg1: i32) -> (i32, i32) {
    %c0_i32 = arith.constant 0 : i32
    %c0_i32_0 = arith.constant 0 : i32
    return %c0_i32, %arg1 : i32, i32
  }
  func.func @transform_5(%arg0: i32, %arg1: i32) -> (i32, i32) {
    %c0_i32 = arith.constant 0 : i32
    return %arg0, %arg1 : i32, i32
  }
}

</mosaic_0001>

<bundles_post_ra>
// kernel: tpu_custom_call.1
= control target key start
LH: loop header
LB: loop body
LE: loop exit
PB: predicated region body
PF: predicated region fallthrough
CT: control target
= control target key end

     0   :  { %10 = vsyncpa [#allocation4], 0  ;;  %s556_s0 = inlined_call_operand.hbm [shape: f32[16,128], index: 0, kind: input, shape index: {}]   ;;  %s557_s1 = inlined_call_operand.hbm [shape: f32[128,128], index: 1, kind: input, shape index: {}]   ;;  %s558_s2 = inlined_call_operand.vmem [shape: f32[1,128], index: 2, kind: input, shape index: {}]   ;;  %s559_s3 = inlined_call_operand.hbm [shape: f32[128,128], index: 3, kind: input, shape index: {}]   ;;  %s560_s4 = inlined_call_operand.vmem [shape: f32[1,128], index: 4, kind: input, shape index: {}]   ;;  %s561_s5 = inlined_call_operand.hbm [shape: f32[16,128], index: 5, kind: output, shape index: {}]  }
   0x1   :  { %11 = vsyncpa [#allocation7], 0 }
   0x2   :  { %12 = vsyncpa [#allocation5], 0  ;;  %s490_s18 = smov [#allocation6]   ;;  %s491_s20 = smov [#allocation3]  }
   0x3   :  { %s30_s19 = sshll.u32 %s490_s18, 4  ;;  %s18_s21 = sshll.u32 %s491_s20, 4  ;;  %s31_s19 = int_to_ptr.vmem [resolvable:$true] %s30_s19  ;;  %s19_s21 = int_to_ptr.vmem [resolvable:$true] %s18_s21 }
   0x4   :  { %s412_s22 = scalar_lea.vmem %s31_s19, 2048  ;;  %p417_p1 = scmp.lt.s32.totalorder %s31_s19, %s31_s19 }
   0x5   :  { %p413_p0 = scmp.ne.s32.totalorder %s31_s19, %s412_s22  ;;  %p418_p2 = scmp.lt.s32.totalorder %s412_s22, %s412_s22 }
   0x7   :  { %p419_p3 = por %p418_p2, %p417_p1 }
   0x9   :  { %p420_p4 = pnand %p419_p3, %p413_p0 }
   0xb   :  { %423 = shalt.err (!%p420_p4)
}
   0xc   :  { %s492_s23 = smov 128   ;;  %s493_s24 = smov 8  }
   0xd   :  { %36 = dma.hbm_to_vmem [thread:$0]  %s557_s1, 2048, %s31_s19, [#allocation7], %s492_s23, %s492_s23, %s493_s24  }
   0xe   :  { %s432_s27 = scalar_lea.vmem %s19_s21, 256  ;;  %p437_p6 = scmp.lt.s32.totalorder %s19_s21, %s19_s21 }
   0xf   :  { %p433_p5 = scmp.ne.s32.totalorder %s19_s21, %s432_s27  ;;  %p438_p7 = scmp.lt.s32.totalorder %s432_s27, %s432_s27 }
  0x11   :  { %p439_p8 = por %p438_p7, %p437_p6 }
  0x13   :  { %p440_p9 = pnand %p439_p8, %p433_p5 }
  0x15   :  { %443 = shalt.err (!%p440_p9)
}
  0x16   :  { %24 = dma.hbm_to_vmem [thread:$0]  %s556_s0, 256, %s19_s21, [#allocation4], %s492_s23, %s492_s23, %s493_s24  }
  0x17   :  { %s494_s30 = smov [#allocation8]  }
  0x18   :  { %s44_s6 = sshll.u32 %s494_s30, 4  ;;  %s45_s6 = int_to_ptr.vmem [resolvable:$true] %s44_s6 }
  0x19   :  { %s452_s7 = scalar_lea.vmem %s45_s6, 2048  ;;  %p457_p11 = scmp.lt.s32.totalorder %s45_s6, %s45_s6 }
  0x1a   :  { %p453_p10 = scmp.ne.s32.totalorder %s45_s6, %s452_s7  ;;  %p458_p12 = scmp.lt.s32.totalorder %s452_s7, %s452_s7 }
  0x1c   :  { %p459_p13 = por %p458_p12, %p457_p11 }
  0x1e   :  { %p460_p0 = pnand %p459_p13, %p453_p10 }
  0x20   :  { %463 = shalt.err (!%p460_p0)
}
  0x21   :  { %50 = dma.hbm_to_vmem [thread:$0]  %s559_s3, 2048, %s45_s6, [#allocation7], %s492_s23, %s492_s23, %s493_s24  }
  0x22   :  { %484 = dma.done.wait [#allocation4], 256  }
  0x23   :  { %485 = vsyncadd [#allocation4], 4294967040 }
  0x24   :  { %486 = dma.done.wait [#allocation7], 4096  }
  0x25   :  { %487 = vsyncadd [#allocation7], 4294963200  ;;  %v83_v0 = vld [vmem:[#allocation6 + $0x78] sm:$0xff]  ;;  %v82_v1 = vld [vmem:[#allocation6 + $0x70] sm:$0xff]  ;;  %s495_s11 = smov [#allocation9]  }
  0x26   :  { %328 = vmatprep.subr.mxu0 %v83_v0  ;;  %v81_v2 = vld [vmem:[#allocation6 + $0x68] sm:$0xff]  ;;  %v80_v3 = vld [vmem:[#allocation6 + $0x60] sm:$0xff]  ;;  %v66_v4 = vld [vmem:[#allocation3] sm:$0xff]  ;;  %s277_s12 = sshll.u32 %s495_s11, 4  ;;  %s278_s12 = int_to_ptr.vmem [resolvable:$true] %s277_s12 }
  0x27   :  { %329 = vmatpush3.msra.mxu0 %v83_v0  ;;  %v79_v5 = vld [vmem:[#allocation6 + $0x58] sm:$0xff]  ;;  %360 = vmatprep.mubr.f32.mxu0 %v66_v4  ;;  %v186_v7 = vld [vmem:[#allocation8 + $0x70] sm:$0xff]  ;;  %v185_v9 = vld [vmem:[#allocation8 + $0x68] sm:$0xff]  ;;  %p469_p2 = scmp.lt.s32.totalorder %s278_s12, %s278_s12 }
  0x28   :  { %330 = vmatprep.subr.mxu0 %v82_v1  ;;  %v187_v6 = vld [vmem:[#allocation8 + $0x78] sm:$0xff]  ;;  %v78_v8 = vld [vmem:[#allocation6 + $0x50] sm:$0xff]  ;;  %v77_v10 = vld [vmem:[#allocation6 + $0x48] sm:$0xff] }
  0x29   :  { %331 = vmatpush3.msra.mxu0 %v82_v1  ;;  %363 = vmatprep.subr.mxu1 %v187_v6  ;;  %v184_v11 = vld [vmem:[#allocation8 + $0x60] sm:$0xff]  ;;  %v183_v13 = vld [vmem:[#allocation8 + $0x58] sm:$0xff]  ;;  %v182_v15 = vld [vmem:[#allocation8 + $0x50] sm:$0xff] }
  0x2a   :  { %332 = vmatprep.subr.mxu0 %v81_v2  ;;  %364 = vmatpush3.msra.mxu1 %v187_v6  ;;  %v76_v12 = vld [vmem:[#allocation6 + $0x40] sm:$0xff]  ;;  %v75_v14 = vld [vmem:[#allocation6 + $0x38] sm:$0xff]  ;;  %v74_v16 = vld [vmem:[#allocation6 + $0x30] sm:$0xff] }
  0x2b   :  { %333 = vmatpush3.msra.mxu0 %v81_v2  ;;  %365 = vmatprep.subr.mxu1 %v186_v7  ;;  %v181_v17 = vld [vmem:[#allocation8 + $0x48] sm:$0xff]  ;;  %v180_v19 = vld [vmem:[#allocation8 + $0x40] sm:$0xff]  ;;  %v179_v21 = vld [vmem:[#allocation8 + $0x38] sm:$0xff] }
  0x2c   :  { %334 = vmatprep.subr.mxu0 %v80_v3  ;;  %366 = vmatpush3.msra.mxu1 %v186_v7  ;;  %v73_v18 = vld [vmem:[#allocation6 + $0x28] sm:$0xff]  ;;  %v72_v20 = vld [vmem:[#allocation6 + $0x20] sm:$0xff]  ;;  %v71_v22 = vld [vmem:[#allocation6 + $0x18] sm:$0xff] }
  0x2d   :  { %335 = vmatpush3.msra.mxu0 %v80_v3  ;;  %367 = vmatprep.subr.mxu1 %v185_v9  ;;  %v178_v23 = vld [vmem:[#allocation8 + $0x30] sm:$0xff]  ;;  %v177_v25 = vld [vmem:[#allocation8 + $0x28] sm:$0xff]  ;;  %v176_v27 = vld [vmem:[#allocation8 + $0x20] sm:$0xff] }
  0x2e   :  { %336 = vmatprep.subr.mxu0 %v79_v5  ;;  %368 = vmatpush3.msra.mxu1 %v185_v9  ;;  %v70_v24 = vld [vmem:[#allocation6 + $0x10] sm:$0xff]  ;;  %v69_v26 = vld [vmem:[#allocation6 + $0x8] sm:$0xff]  ;;  %v68_v28 = vld [vmem:[#allocation6] sm:$0xff] }
  0x2f   :  { %337 = vmatpush3.msra.mxu0 %v79_v5  ;;  %369 = vmatprep.subr.mxu1 %v184_v11  ;;  %v67_v29 = vld [vmem:[#allocation3 + $0x8] sm:$0xff]  ;;  %v174_v31 = vld [vmem:[#allocation8 + $0x10] sm:$0xff]  ;;  %v173_v32 = vld [vmem:[#allocation8 + $0x8] sm:$0xff] }
  0x30   :  { %338 = vmatprep.subr.mxu0 %v78_v8  ;;  %370 = vmatpush3.msra.mxu1 %v184_v11  ;;  %v175_v30 = vld [vmem:[#allocation8 + $0x18] sm:$0xff]  ;;  %v172_v33 = vld [vmem:[#allocation8] sm:$0xff]  ;;  %v290_v34 = vld [vmem:[%s558_s2] ss:$0 sm:$0xff]  ;;  %s464_s2 = scalar_lea.vmem %s278_s12, 256 }
  0x31   :  { %339 = vmatpush3.msra.mxu0 %v78_v8  ;;  %371 = vmatprep.subr.mxu1 %v183_v13  ;;  %v291_v41 = vld [vmem:[%s560_s4] ss:$0 sm:$0xff]  ;;  %p465_p1 = scmp.ne.s32.totalorder %s278_s12, %s464_s2  ;;  %p470_p3 = scmp.lt.s32.totalorder %s464_s2, %s464_s2 }
  0x32   :  { %340 = vmatprep.subr.mxu0 %v77_v10  ;;  %372 = vmatpush3.msra.mxu1 %v183_v13 }
  0x33   :  { %341 = vmatpush3.msra.mxu0 %v77_v10  ;;  %373 = vmatprep.subr.mxu1 %v182_v15  ;;  %p471_p4 = por %p470_p3, %p469_p2 }
  0x34   :  { %342 = vmatprep.subr.mxu0 %v76_v12  ;;  %374 = vmatpush3.msra.mxu1 %v182_v15 }
  0x35   :  { %343 = vmatpush3.msra.mxu0 %v76_v12  ;;  %375 = vmatprep.subr.mxu1 %v181_v17  ;;  %p472_p5 = pnand %p471_p4, %p465_p1 }
  0x36   :  { %344 = vmatprep.subr.mxu0 %v75_v14  ;;  %376 = vmatpush3.msra.mxu1 %v181_v17 }
  0x37   :  { %345 = vmatpush3.msra.mxu0 %v75_v14  ;;  %377 = vmatprep.subr.mxu1 %v180_v19 }
  0x38   :  { %346 = vmatprep.subr.mxu0 %v74_v16  ;;  %378 = vmatpush3.msra.mxu1 %v180_v19 }
  0x39   :  { %347 = vmatpush3.msra.mxu0 %v74_v16  ;;  %379 = vmatprep.subr.mxu1 %v179_v21 }
  0x3a   :  { %348 = vmatprep.subr.mxu0 %v73_v18  ;;  %380 = vmatpush3.msra.mxu1 %v179_v21 }
  0x3b   :  { %349 = vmatpush3.msra.mxu0 %v73_v18  ;;  %381 = vmatprep.subr.mxu1 %v178_v23 }
  0x3c   :  { %350 = vmatprep.subr.mxu0 %v72_v20  ;;  %382 = vmatpush3.msra.mxu1 %v178_v23 }
  0x3d   :  { %351 = vmatpush3.msra.mxu0 %v72_v20  ;;  %383 = vmatprep.subr.mxu1 %v177_v25 }
  0x3e   :  { %352 = vmatprep.subr.mxu0 %v71_v22  ;;  %384 = vmatpush3.msra.mxu1 %v177_v25 }
  0x3f   :  { %353 = vmatpush3.msra.mxu0 %v71_v22  ;;  %385 = vmatprep.subr.mxu1 %v176_v27 }
  0x40   :  { %354 = vmatprep.subr.mxu0 %v70_v24  ;;  %386 = vmatpush3.msra.mxu1 %v176_v27 }
  0x41   :  { %355 = vmatpush3.msra.mxu0 %v70_v24  ;;  %387 = vmatprep.subr.mxu1 %v175_v30 }
  0x42   :  { %356 = vmatprep.subr.mxu0 %v69_v26  ;;  %388 = vmatpush3.msra.mxu1 %v175_v30 }
  0x43   :  { %357 = vmatpush3.msra.mxu0 %v69_v26  ;;  %389 = vmatprep.subr.mxu1 %v174_v31 }
  0x44   :  { %358 = vmatprep.subr.mxu0 %v68_v28  ;;  %390 = vmatpush3.msra.mxu1 %v174_v31 }
  0x45   :  { %359 = vmatpush3.msra.mxu0 %v68_v28  ;;  %391 = vmatprep.subr.mxu1 %v173_v32 }
  0x46   :  { %361 = vmatmul.mubr.f32.vlgmr.msra.gmra.mxu0 %v67_v29  ;;  %392 = vmatpush3.msra.mxu1 %v173_v32 }
  0x47   :  { %393 = vmatprep.subr.mxu1 %v172_v33 }
  0x48   :  { %394 = vmatpush3.msra.mxu1 %v172_v33 }
 0x106   :  { %v362_v35 = vpop.f32.mrf.mxu0 }
 0x107   :  { %v163_v36 = vadd.f32 %v362_v35, %v290_v34 }
 0x108   :  { %v157_v37 = vpop.f32.mrf.mxu0 }
 0x109   :  { %v158_v38 = vadd.f32 %v290_v34, %v157_v37  ;;  %v167_v40 = vmax.f32 %v163_v36, 0.0 }
 0x10b   :  { %v166_v39 = vmax.f32 %v158_v38, 0.0 }
 0x10d   :  { %395 = vmatprep.mubr.f32.mxu1 %v166_v39 }
 0x10e   :  { %396 = vmatmul.mubr.f32.vlgmr.msra.gmra.mxu1 %v167_v40 }
 0x1ce   :  { %v397_v42 = vpop.f32.mrf.mxu1 }
 0x1cf   :  { %v267_v43 = vadd.f32 %v397_v42, %v291_v41 }
 0x1d0   :  { %v261_v44 = vpop.f32.mrf.mxu1 }
 0x1d1   :  { %271 = vst [vmem:[#allocation9 + $0x8] sm:$0xff] %v267_v43  ;;  %v262_v45 = vadd.f32 %v291_v41, %v261_v44 }
 0x1d3   :  { %270 = vst [vmem:[#allocation9] sm:$0xff] %v262_v45 }
 0x1d4   :  { %475 = shalt.err (!%p472_p5)
}
 0x1d5   :  { %283 = dma.vmem_to_hbm [thread:$0]  %s278_s12, 256, %s561_s5, [#allocation5], %s492_s23, %s492_s23, %s493_s24  }
 0x1d6   :  { %488 = dma.done.wait [#allocation5], 256  }
 0x1d7   :  { %489 = vsyncadd [#allocation5], 4294967040 }
 0x1d8   :  { %287 = vsyncpa [#allocation4], 1 }
 0x1d9   :  { %288 = vsyncpa [#allocation7], 1 }
 0x1da   :  { %289 = vsyncpa [#allocation5], 1 }

// kernel: tpu_custom_call.1
= control target key start
LH: loop header
LB: loop body
LE: loop exit
PB: predicated region body
PF: predicated region fallthrough
CT: control target
= control target key end

     0   :  { %10 = vsyncpa [#allocation4], 0  ;;  %s556_s0 = inlined_call_operand.hbm [shape: f32[16,128], index: 0, kind: input, shape index: {}]   ;;  %s557_s1 = inlined_call_operand.hbm [shape: f32[128,128], index: 1, kind: input, shape index: {}]   ;;  %s558_s2 = inlined_call_operand.vmem [shape: f32[1,128], index: 2, kind: input, shape index: {}]   ;;  %s559_s3 = inlined_call_operand.hbm [shape: f32[128,128], index: 3, kind: input, shape index: {}]   ;;  %s560_s4 = inlined_call_operand.vmem [shape: f32[1,128], index: 4, kind: input, shape index: {}]   ;;  %s561_s5 = inlined_call_operand.hbm [shape: f32[16,128], index: 5, kind: output, shape index: {}]  }
   0x1   :  { %11 = vsyncpa [#allocation7], 0 }
   0x2   :  { %12 = vsyncpa [#allocation5], 0  ;;  %s490_s18 = smov [#allocation6]   ;;  %s491_s20 = smov [#allocation3]  }
   0x3   :  { %s30_s19 = sshll.u32 %s490_s18, 4  ;;  %s18_s21 = sshll.u32 %s491_s20, 4  ;;  %s31_s19 = int_to_ptr.vmem [resolvable:$true] %s30_s19  ;;  %s19_s21 = int_to_ptr.vmem [resolvable:$true] %s18_s21 }
   0x4   :  { %s412_s22 = scalar_lea.vmem %s31_s19, 2048  ;;  %p417_p1 = scmp.lt.s32.totalorder %s31_s19, %s31_s19 }
   0x5   :  { %p413_p0 = scmp.ne.s32.totalorder %s31_s19, %s412_s22  ;;  %p418_p2 = scmp.lt.s32.totalorder %s412_s22, %s412_s22 }
   0x7   :  { %p419_p3 = por %p418_p2, %p417_p1 }
   0x9   :  { %p420_p4 = pnand %p419_p3, %p413_p0 }
   0xb   :  { %423 = shalt.err (!%p420_p4)
}
   0xc   :  { %s492_s23 = smov 128   ;;  %s493_s24 = smov 8  }
   0xd   :  { %36 = dma.hbm_to_vmem [thread:$0]  %s557_s1, 2048, %s31_s19, [#allocation7], %s492_s23, %s492_s23, %s493_s24  }
   0xe   :  { %s432_s27 = scalar_lea.vmem %s19_s21, 256  ;;  %p437_p6 = scmp.lt.s32.totalorder %s19_s21, %s19_s21 }
   0xf   :  { %p433_p5 = scmp.ne.s32.totalorder %s19_s21, %s432_s27  ;;  %p438_p7 = scmp.lt.s32.totalorder %s432_s27, %s432_s27 }
  0x11   :  { %p439_p8 = por %p438_p7, %p437_p6 }
  0x13   :  { %p440_p9 = pnand %p439_p8, %p433_p5 }
  0x15   :  { %443 = shalt.err (!%p440_p9)
}
  0x16   :  { %24 = dma.hbm_to_vmem [thread:$0]  %s556_s0, 256, %s19_s21, [#allocation4], %s492_s23, %s492_s23, %s493_s24  }
  0x17   :  { %s494_s30 = smov [#allocation8]  }
  0x18   :  { %s44_s6 = sshll.u32 %s494_s30, 4  ;;  %s45_s6 = int_to_ptr.vmem [resolvable:$true] %s44_s6 }
  0x19   :  { %s452_s7 = scalar_lea.vmem %s45_s6, 2048  ;;  %p457_p11 = scmp.lt.s32.totalorder %s45_s6, %s45_s6 }
  0x1a   :  { %p453_p10 = scmp.ne.s32.totalorder %s45_s6, %s452_s7  ;;  %p458_p12 = scmp.lt.s32.totalorder %s452_s7, %s452_s7 }
  0x1c   :  { %p459_p13 = por %p458_p12, %p457_p11 }
  0x1e   :  { %p460_p0 = pnand %p459_p13, %p453_p10 }
  0x20   :  { %463 = shalt.err (!%p460_p0)
}
  0x21   :  { %50 = dma.hbm_to_vmem [thread:$0]  %s559_s3, 2048, %s45_s6, [#allocation7], %s492_s23, %s492_s23, %s493_s24  }
  0x22   :  { %484 = dma.done.wait [#allocation4], 256  }
  0x23   :  { %485 = vsyncadd [#allocation4], 4294967040 }
  0x24   :  { %486 = dma.done.wait [#allocation7], 4096  }
  0x25   :  { %487 = vsyncadd [#allocation7], 4294963200  ;;  %v83_v0 = vld [vmem:[#allocation6 + $0x78] sm:$0xff]  ;;  %v82_v1 = vld [vmem:[#allocation6 + $0x70] sm:$0xff]  ;;  %s495_s11 = smov [#allocation9]  }
  0x26   :  { %328 = vmatprep.subr.mxu0 %v83_v0  ;;  %v81_v2 = vld [vmem:[#allocation6 + $0x68] sm:$0xff]  ;;  %v80_v3 = vld [vmem:[#allocation6 + $0x60] sm:$0xff]  ;;  %v66_v4 = vld [vmem:[#allocation3] sm:$0xff]  ;;  %s277_s12 = sshll.u32 %s495_s11, 4  ;;  %s278_s12 = int_to_ptr.vmem [resolvable:$true] %s277_s12 }
  0x27   :  { %329 = vmatpush3.msra.mxu0 %v83_v0  ;;  %v79_v5 = vld [vmem:[#allocation6 + $0x58] sm:$0xff]  ;;  %360 = vmatprep.mubr.f32.mxu0 %v66_v4  ;;  %v186_v7 = vld [vmem:[#allocation8 + $0x70] sm:$0xff]  ;;  %v185_v9 = vld [vmem:[#allocation8 + $0x68] sm:$0xff]  ;;  %p469_p2 = scmp.lt.s32.totalorder %s278_s12, %s278_s12 }
  0x28   :  { %330 = vmatprep.subr.mxu0 %v82_v1  ;;  %v187_v6 = vld [vmem:[#allocation8 + $0x78] sm:$0xff]  ;;  %v78_v8 = vld [vmem:[#allocation6 + $0x50] sm:$0xff]  ;;  %v77_v10 = vld [vmem:[#allocation6 + $0x48] sm:$0xff] }
  0x29   :  { %331 = vmatpush3.msra.mxu0 %v82_v1  ;;  %363 = vmatprep.subr.mxu1 %v187_v6  ;;  %v184_v11 = vld [vmem:[#allocation8 + $0x60] sm:$0xff]  ;;  %v183_v13 = vld [vmem:[#allocation8 + $0x58] sm:$0xff]  ;;  %v182_v15 = vld [vmem:[#allocation8 + $0x50] sm:$0xff] }
  0x2a   :  { %332 = vmatprep.subr.mxu0 %v81_v2  ;;  %364 = vmatpush3.msra.mxu1 %v187_v6  ;;  %v76_v12 = vld [vmem:[#allocation6 + $0x40] sm:$0xff]  ;;  %v75_v14 = vld [vmem:[#allocation6 + $0x38] sm:$0xff]  ;;  %v74_v16 = vld [vmem:[#allocation6 + $0x30] sm:$0xff] }
  0x2b   :  { %333 = vmatpush3.msra.mxu0 %v81_v2  ;;  %365 = vmatprep.subr.mxu1 %v186_v7  ;;  %v181_v17 = vld [vmem:[#allocation8 + $0x48] sm:$0xff]  ;;  %v180_v19 = vld [vmem:[#allocation8 + $0x40] sm:$0xff]  ;;  %v179_v21 = vld [vmem:[#allocation8 + $0x38] sm:$0xff] }
  0x2c   :  { %334 = vmatprep.subr.mxu0 %v80_v3  ;;  %366 = vmatpush3.msra.mxu1 %v186_v7  ;;  %v73_v18 = vld [vmem:[#allocation6 + $0x28] sm:$0xff]  ;;  %v72_v20 = vld [vmem:[#allocation6 + $0x20] sm:$0xff]  ;;  %v71_v22 = vld [vmem:[#allocation6 + $0x18] sm:$0xff] }
  0x2d   :  { %335 = vmatpush3.msra.mxu0 %v80_v3  ;;  %367 = vmatprep.subr.mxu1 %v185_v9  ;;  %v178_v23 = vld [vmem:[#allocation8 + $0x30] sm:$0xff]  ;;  %v177_v25 = vld [vmem:[#allocation8 + $0x28] sm:$0xff]  ;;  %v176_v27 = vld [vmem:[#allocation8 + $0x20] sm:$0xff] }
  0x2e   :  { %336 = vmatprep.subr.mxu0 %v79_v5  ;;  %368 = vmatpush3.msra.mxu1 %v185_v9  ;;  %v70_v24 = vld [vmem:[#allocation6 + $0x10] sm:$0xff]  ;;  %v69_v26 = vld [vmem:[#allocation6 + $0x8] sm:$0xff]  ;;  %v68_v28 = vld [vmem:[#allocation6] sm:$0xff] }
  0x2f   :  { %337 = vmatpush3.msra.mxu0 %v79_v5  ;;  %369 = vmatprep.subr.mxu1 %v184_v11  ;;  %v67_v29 = vld [vmem:[#allocation3 + $0x8] sm:$0xff]  ;;  %v174_v31 = vld [vmem:[#allocation8 + $0x10] sm:$0xff]  ;;  %v173_v32 = vld [vmem:[#allocation8 + $0x8] sm:$0xff] }
  0x30   :  { %338 = vmatprep.subr.mxu0 %v78_v8  ;;  %370 = vmatpush3.msra.mxu1 %v184_v11  ;;  %v175_v30 = vld [vmem:[#allocation8 + $0x18] sm:$0xff]  ;;  %v172_v33 = vld [vmem:[#allocation8] sm:$0xff]  ;;  %v290_v34 = vld [vmem:[%s558_s2] ss:$0 sm:$0xff]  ;;  %s464_s2 = scalar_lea.vmem %s278_s12, 256 }
  0x31   :  { %339 = vmatpush3.msra.mxu0 %v78_v8  ;;  %371 = vmatprep.subr.mxu1 %v183_v13  ;;  %v291_v41 = vld [vmem:[%s560_s4] ss:$0 sm:$0xff]  ;;  %p465_p1 = scmp.ne.s32.totalorder %s278_s12, %s464_s2  ;;  %p470_p3 = scmp.lt.s32.totalorder %s464_s2, %s464_s2 }
  0x32   :  { %340 = vmatprep.subr.mxu0 %v77_v10  ;;  %372 = vmatpush3.msra.mxu1 %v183_v13 }
  0x33   :  { %341 = vmatpush3.msra.mxu0 %v77_v10  ;;  %373 = vmatprep.subr.mxu1 %v182_v15  ;;  %p471_p4 = por %p470_p3, %p469_p2 }
  0x34   :  { %342 = vmatprep.subr.mxu0 %v76_v12  ;;  %374 = vmatpush3.msra.mxu1 %v182_v15 }
  0x35   :  { %343 = vmatpush3.msra.mxu0 %v76_v12  ;;  %375 = vmatprep.subr.mxu1 %v181_v17  ;;  %p472_p5 = pnand %p471_p4, %p465_p1 }
  0x36   :  { %344 = vmatprep.subr.mxu0 %v75_v14  ;;  %376 = vmatpush3.msra.mxu1 %v181_v17 }
  0x37   :  { %345 = vmatpush3.msra.mxu0 %v75_v14  ;;  %377 = vmatprep.subr.mxu1 %v180_v19 }
  0x38   :  { %346 = vmatprep.subr.mxu0 %v74_v16  ;;  %378 = vmatpush3.msra.mxu1 %v180_v19 }
  0x39   :  { %347 = vmatpush3.msra.mxu0 %v74_v16  ;;  %379 = vmatprep.subr.mxu1 %v179_v21 }
  0x3a   :  { %348 = vmatprep.subr.mxu0 %v73_v18  ;;  %380 = vmatpush3.msra.mxu1 %v179_v21 }
  0x3b   :  { %349 = vmatpush3.msra.mxu0 %v73_v18  ;;  %381 = vmatprep.subr.mxu1 %v178_v23 }
  0x3c   :  { %350 = vmatprep.subr.mxu0 %v72_v20  ;;  %382 = vmatpush3.msra.mxu1 %v178_v23 }
  0x3d   :  { %351 = vmatpush3.msra.mxu0 %v72_v20  ;;  %383 = vmatprep.subr.mxu1 %v177_v25 }
  0x3e   :  { %352 = vmatprep.subr.mxu0 %v71_v22  ;;  %384 = vmatpush3.msra.mxu1 %v177_v25 }
  0x3f   :  { %353 = vmatpush3.msra.mxu0 %v71_v22  ;;  %385 = vmatprep.subr.mxu1 %v176_v27 }
  0x40   :  { %354 = vmatprep.subr.mxu0 %v70_v24  ;;  %386 = vmatpush3.msra.mxu1 %v176_v27 }
  0x41   :  { %355 = vmatpush3.msra.mxu0 %v70_v24  ;;  %387 = vmatprep.subr.mxu1 %v175_v30 }
  0x42   :  { %356 = vmatprep.subr.mxu0 %v69_v26  ;;  %388 = vmatpush3.msra.mxu1 %v175_v30 }
  0x43   :  { %357 = vmatpush3.msra.mxu0 %v69_v26  ;;  %389 = vmatprep.subr.mxu1 %v174_v31 }
  0x44   :  { %358 = vmatprep.subr.mxu0 %v68_v28  ;;  %390 = vmatpush3.msra.mxu1 %v174_v31 }
  0x45   :  { %359 = vmatpush3.msra.mxu0 %v68_v28  ;;  %391 = vmatprep.subr.mxu1 %v173_v32 }
  0x46   :  { %361 = vmatmul.mubr.f32.vlgmr.msra.gmra.mxu0 %v67_v29  ;;  %392 = vmatpush3.msra.mxu1 %v173_v32 }
  0x47   :  { %393 = vmatprep.subr.mxu1 %v172_v33 }
  0x48   :  { %394 = vmatpush3.msra.mxu1 %v172_v33 }
 0x106   :  { %v362_v35 = vpop.f32.mrf.mxu0 }
 0x107   :  { %v163_v36 = vadd.f32 %v362_v35, %v290_v34 }
 0x108   :  { %v157_v37 = vpop.f32.mrf.mxu0 }
 0x109   :  { %v158_v38 = vadd.f32 %v290_v34, %v157_v37  ;;  %v167_v40 = vmax.f32 %v163_v36, 0.0 }
 0x10b   :  { %v166_v39 = vmax.f32 %v158_v38, 0.0 }
 0x10d   :  { %395 = vmatprep.mubr.f32.mxu1 %v166_v39 }
 0x10e   :  { %396 = vmatmul.mubr.f32.vlgmr.msra.gmra.mxu1 %v167_v40 }
 0x1ce   :  { %v397_v42 = vpop.f32.mrf.mxu1 }
 0x1cf   :  { %v267_v43 = vadd.f32 %v397_v42, %v291_v41 }
 0x1d0   :  { %v261_v44 = vpop.f32.mrf.mxu1 }
 0x1d1   :  { %271 = vst [vmem:[#allocation9 + $0x8] sm:$0xff] %v267_v43  ;;  %v262_v45 = vadd.f32 %v291_v41, %v261_v44 }
 0x1d3   :  { %270 = vst [vmem:[#allocation9] sm:$0xff] %v262_v45 }
 0x1d4   :  { %475 = shalt.err (!%p472_p5)
}
 0x1d5   :  { %283 = dma.vmem_to_hbm [thread:$0]  %s278_s12, 256, %s561_s5, [#allocation5], %s492_s23, %s492_s23, %s493_s24  }
 0x1d6   :  { %488 = dma.done.wait [#allocation5], 256  }
 0x1d7   :  { %489 = vsyncadd [#allocation5], 4294967040 }
 0x1d8   :  { %287 = vsyncpa [#allocation4], 1 }
 0x1d9   :  { %288 = vsyncpa [#allocation7], 1 }
 0x1da   :  { %289 = vsyncpa [#allocation5], 1 }

</bundles_post_ra>
